<compile_context>
chip_gen: v5e
topology: v5e:2x2
jax: 0.10.0
libtpu: 0.0.40
codegen_flags: <defaults>
</compile_context>

<pallas_src>
import functools

import jax
import jax.numpy as jnp
from jax.experimental import pallas as pl
from jax.experimental.pallas import tpu as pltpu


def _round_up(x, m):
    return ((x + m - 1) // m) * m


def _pad2d(a, rows, cols):
    pr, pc = rows - a.shape[0], cols - a.shape[1]
    if pr or pc:
        a = jnp.pad(a, ((0, pr), (0, pc)))
    return a


def encoder_kernel(x_ref, w_ref, b_ref, o_ref, acc_ref):
    """One (tm, tn) output tile, accumulated over the K grid axis.

    x_ref: (tm, tk)   w_ref: (tk, tn)   b_ref: (1, tn)
    o_ref: (tm, tn)   acc_ref: (tm, tn) f32 scratch
    """
    k = pl.program_id(2)

    @pl.when(k == 0)
    def _():
        acc_ref[...] = jnp.zeros_like(acc_ref)

    acc_ref[...] += jnp.dot(
        x_ref[...], w_ref[...], preferred_element_type=jnp.float32
    )

    @pl.when(k == pl.num_programs(2) - 1)
    def _():
        # Bias add + ReLU epilogue in f32, single lane-dense store.
        o_ref[...] = jnp.maximum(acc_ref[...] + b_ref[...], 0.0).astype(o_ref.dtype)


@functools.partial(jax.jit, static_argnames=("tm", "tn", "tk", "compute_dtype"))
def encoder_forward(x, weight, bias, *, tm=256, tn=256, tk=512, compute_dtype=None):
    """ReLU(x @ weight.T + bias), PyTorch nn.Linear layout.

    x:      (B, IN)  float
    weight: (H, IN)  float   (PyTorch Linear weight layout)
    bias:   (H,)     float
    returns (B, H) in x.dtype
    compute_dtype: optionally cast x / weight to bf16 for the MXU (v6e/v7x);
                   accumulation stays f32.
    """
    B, IN = x.shape
    H = weight.shape[0]
    out_dtype = x.dtype

    w_t = weight.T  # (IN, H)
    if compute_dtype is not None:
        x = x.astype(compute_dtype)
        w_t = w_t.astype(compute_dtype)

    # Clamp tile sizes to the (128/8-aligned) padded problem size so small
    # problems become a single grid step while large ones tile properly.
    tm_eff = min(tm, _round_up(B, 8))
    tn_eff = min(tn, _round_up(H, 128))   # lane-dense output tiles
    tk_eff = min(tk, _round_up(IN, 128))

    Bp = _round_up(B, tm_eff)
    Hp = _round_up(H, tn_eff)
    INp = _round_up(IN, tk_eff)

    # Zero padding is mathematically inert for matmul + bias + ReLU and is
    # sliced off below; it buys full-width (unmasked) vector stores.
    x_p = _pad2d(x, Bp, INp)
    w_p = _pad2d(w_t, INp, Hp)
    b_p = _pad2d(bias.reshape(1, H).astype(jnp.float32), 1, Hp)

    grid = (Bp // tm_eff, Hp // tn_eff, INp // tk_eff)

    # Explicit VMEM budget: double-buffered input/output blocks + accumulator.
    itemsize = x_p.dtype.itemsize
    block_bytes = (
        2 * (tm_eff * tk_eff + tk_eff * tn_eff) * itemsize   # x, w (dbl-buffered)
        + 2 * (tm_eff * tn_eff) * out_dtype.itemsize         # out (dbl-buffered)
        + 2 * tn_eff * 4                                     # bias
        + tm_eff * tn_eff * 4                                # f32 accumulator
    )
    vmem_limit = int(min(max(2 * block_bytes, 16 * 1024 * 1024), 48 * 1024 * 1024))

    cost = pl.CostEstimate(
        flops=2 * Bp * INp * Hp,
        transcendentals=0,
        bytes_accessed=(x_p.size * itemsize + w_p.size * itemsize
                        + b_p.size * 4 + Bp * Hp * out_dtype.itemsize),
    )

    out_p = pl.pallas_call(
        encoder_kernel,
        out_shape=jax.ShapeDtypeStruct((Bp, Hp), out_dtype),
        grid_spec=pltpu.PrefetchScalarGridSpec(
            num_scalar_prefetch=0,
            grid=grid,
            in_specs=[
                pl.BlockSpec((tm_eff, tk_eff), lambda i, j, k: (i, k)),  # x
                pl.BlockSpec((tk_eff, tn_eff), lambda i, j, k: (k, j)),  # W^T
                pl.BlockSpec((1, tn_eff), lambda i, j, k: (0, j)),       # bias
            ],
            out_specs=pl.BlockSpec((tm_eff, tn_eff), lambda i, j, k: (i, j)),
            scratch_shapes=[pltpu.VMEM((tm_eff, tn_eff), jnp.float32)],
        ),
        compiler_params=pltpu.CompilerParams(
            dimension_semantics=("parallel", "parallel", "arbitrary"),
            vmem_limit_bytes=vmem_limit,
        ),
        cost_estimate=cost,
    )(x_p, w_p, b_p)

    return out_p[:B, :H]


if __name__ == "__main__":
    # Small shapes implied by the module: batch=8, input_size=16, hidden_size=32
    batch, input_size, hidden_size = 8, 16, 32

    key = jax.random.PRNGKey(0)
    kx, kw, kb = jax.random.split(key, 3)

    x = jax.random.normal(kx, (batch, input_size), dtype=jnp.float32)
    # Deterministic "init" mimicking nn.Linear's uniform(-1/sqrt(in), 1/sqrt(in))
    bound = 1.0 / (input_size ** 0.5)
    weight = jax.random.uniform(kw, (hidden_size, input_size),
                                minval=-bound, maxval=bound, dtype=jnp.float32)
    bias = jax.random.uniform(kb, (hidden_size,),
                              minval=-bound, maxval=bound, dtype=jnp.float32)

    # f32 path for the tight correctness check; pass compute_dtype=jnp.bfloat16
    # at large B/IN/H on v6e/v7x for MXU throughput (loosen tolerance ~1e-2).
    out = encoder_forward(x, weight, bias)
    out = jax.block_until_ready(out)

    # Reference check against plain JAX (same math as torch Linear + ReLU)
    ref = jnp.maximum(x @ weight.T + bias, 0.0)
    assert out.shape == (batch, hidden_size)
    assert jnp.allclose(out, ref, atol=1e-5, rtol=1e-5)

    print("KERNEL_OK")
</pallas_src>

<mosaic_0001>
module attributes {stable_mosaic.version = 11 : i64} {
  func.func @encoder_kernel(%arg0: i32, %arg1: i32, %arg2: i32, %arg3: memref<8x128xf32, #tpu.memory_space<vmem>>, %arg4: memref<128x128xf32, #tpu.memory_space<vmem>>, %arg5: memref<1x128xf32, #tpu.memory_space<vmem>>, %arg6: memref<8x128xf32, #tpu.memory_space<vmem>>, %arg7: memref<8x128xf32, #tpu.memory_space<vmem>>) attributes {dimension_semantics = [#tpu.dimension_semantics<parallel>, #tpu.dimension_semantics<parallel>, #tpu.dimension_semantics<arbitrary>], iteration_bounds = array<i64: 1, 1, 1>, scalar_prefetch = 0 : i64, scratch_operands = 1 : i64, tpu.core_type = #tpu.core_type<tc>, window_params = [{transform_indices = @transform_0, window_bounds = array<i64: 8, 128>}, {transform_indices = @transform_1, window_bounds = array<i64: 128, 128>}, {transform_indices = @transform_2, window_bounds = array<i64: 1, 128>}, {transform_indices = @transform_3, window_bounds = array<i64: 8, 128>}]} {
    %c0_i32 = arith.constant 0 : i32
    %0 = arith.cmpi eq, %arg2, %c0_i32 : i32
    %1 = arith.extui %0 : i1 to i32
    %c0_i32_0 = arith.constant 0 : i32
    %2 = arith.cmpi ne, %1, %c0_i32_0 : i32
    scf.if %2 {
      %cst_10 = arith.constant 0.000000e+00 : f32
      %12 = vector.broadcast %cst_10 : f32 to vector<8x128xf32>
      %c0_11 = arith.constant 0 : index
      %c0_12 = arith.constant 0 : index
      %13 = vector.load %arg7[%c0_11, %c0_12] : memref<8x128xf32, #tpu.memory_space<vmem>>, vector<8x128xf32>
      tpu.vector_store %arg7[%c0_11, %c0_12], %12 {strides = array<i32>} : memref<8x128xf32, #tpu.memory_space<vmem>>, vector<8x128xf32>,
    } else {
    }
    %c0 = arith.constant 0 : index
    %c0_1 = arith.constant 0 : index
    %3 = vector.load %arg7[%c0, %c0_1] : memref<8x128xf32, #tpu.memory_space<vmem>>, vector<8x128xf32>
    %c0_2 = arith.constant 0 : index
    %c0_3 = arith.constant 0 : index
    %4 = vector.load %arg3[%c0_2, %c0_3] : memref<8x128xf32, #tpu.memory_space<vmem>>, vector<8x128xf32>
    %c0_4 = arith.constant 0 : index
    %c0_5 = arith.constant 0 : index
    %5 = vector.load %arg4[%c0_4, %c0_5] : memref<128x128xf32, #tpu.memory_space<vmem>>, vector<128x128xf32>
    %cst = arith.constant dense<0.000000e+00> : vector<8x128xf32>
    %6 = tpu.matmul %4, %5, %cst {dimension_numbers = #tpu.dot_dimension_numbers<[1], [0], [0], [1], [0, 0, 1, 1], [], []>} : vector<8x128xf32>, vector<128x128xf32>, vector<8x128xf32> -> vector<8x128xf32>
    %7 = arith.addf %3, %6 : vector<8x128xf32>
    %c0_6 = arith.constant 0 : index
    %c0_7 = arith.constant 0 : index
    %8 = vector.load %arg7[%c0_6, %c0_7] : memref<8x128xf32, #tpu.memory_space<vmem>>, vector<8x128xf32>
    tpu.vector_store %arg7[%c0_6, %c0_7], %7 {strides = array<i32>} : memref<8x128xf32, #tpu.memory_space<vmem>>, vector<8x128xf32>,
    %c0_i32_8 = arith.constant 0 : i32
    %9 = arith.cmpi eq, %arg2, %c0_i32_8 : i32
    %10 = arith.extui %9 : i1 to i32
    %c0_i32_9 = arith.constant 0 : i32
    %11 = arith.cmpi ne, %10, %c0_i32_9 : i32
    scf.if %11 {
      %c0_10 = arith.constant 0 : index
      %c0_11 = arith.constant 0 : index
      %12 = vector.load %arg7[%c0_10, %c0_11] : memref<8x128xf32, #tpu.memory_space<vmem>>, vector<8x128xf32>
      %c0_12 = arith.constant 0 : index
      %c0_13 = arith.constant 0 : index
      %13 = vector.load %arg5[%c0_12, %c0_13] : memref<1x128xf32, #tpu.memory_space<vmem>>, vector<1x128xf32>
      %14 = vector.broadcast %13 : vector<1x128xf32> to vector<8x128xf32>
      %15 = arith.addf %12, %14 : vector<8x128xf32>
      %cst_14 = arith.constant 0.000000e+00 : f32
      %16 = vector.broadcast %cst_14 : f32 to vector<8x128xf32>
      %17 = arith.maximumf %15, %16 : vector<8x128xf32>
      %c0_15 = arith.constant 0 : index
      %c0_16 = arith.constant 0 : index
      %18 = vector.load %arg6[%c0_15, %c0_16] : memref<8x128xf32, #tpu.memory_space<vmem>>, vector<8x128xf32>
      tpu.vector_store %arg6[%c0_15, %c0_16], %17 {strides = array<i32>} : memref<8x128xf32, #tpu.memory_space<vmem>>, vector<8x128xf32>,
    } else {
    }
    return
  }
  func.func @transform_0(%arg0: i32, %arg1: i32, %arg2: i32) -> (i32, i32) {
    %c0_i32 = arith.constant 0 : i32
    return %arg0, %arg2 : i32, i32
  }
  func.func @transform_1(%arg0: i32, %arg1: i32, %arg2: i32) -> (i32, i32) {
    %c0_i32 = arith.constant 0 : i32
    return %arg2, %arg1 : i32, i32
  }
  func.func @transform_2(%arg0: i32, %arg1: i32, %arg2: i32) -> (i32, i32) {
    %c0_i32 = arith.constant 0 : i32
    %c0_i32_0 = arith.constant 0 : i32
    return %c0_i32, %arg1 : i32, i32
  }
  func.func @transform_3(%arg0: i32, %arg1: i32, %arg2: i32) -> (i32, i32) {
    %c0_i32 = arith.constant 0 : i32
    return %arg0, %arg1 : i32, i32
  }
}

</mosaic_0001>

<bundles_post_ra>
// kernel: encoder_forward.1
= control target key start
LH: loop header
LB: loop body
LE: loop exit
PB: predicated region body
PF: predicated region fallthrough
CT: control target
= control target key end

     0   :  { %s193_s0 = inlined_call_operand.vmem [shape: f32[8,128], index: 0, kind: input, shape index: {}]   ;;  %s194_s1 = inlined_call_operand.vmem [shape: f32[128,128], index: 1, kind: input, shape index: {}]   ;;  %s195_s2 = inlined_call_operand.vmem [shape: f32[1,128], index: 2, kind: input, shape index: {}]   ;;  %s196_s3 = inlined_call_operand.hbm [shape: f32[8,128], index: 3, kind: output, shape index: {}]  }
   0x1   :  { %v37_v0 = vld [vmem:[%s194_s1 + $0x78] sm:$0xff]  ;;  %v36_v1 = vld [vmem:[%s194_s1 + $0x70] sm:$0xff]  ;;  %v35_v2 = vld [vmem:[%s194_s1 + $0x68] sm:$0xff] }
   0x2   :  { %38 = vmatpush.msra.mxu0 %v37_v0  ;;  %v34_v3 = vld [vmem:[%s194_s1 + $0x60] sm:$0xff]  ;;  %v33_v4 = vld [vmem:[%s194_s1 + $0x58] sm:$0xff] }
   0x4   :  { %39 = vmatpush.msra.mxu0 %v36_v1 }
   0x6   :  { %40 = vmatpush.msra.mxu0 %v35_v2 }
   0x7   :  { %8 = vsyncpa [#allocation4], 0  ;;  %v32_v5 = vld [vmem:[%s194_s1 + $0x50] sm:$0xff]  ;;  %v31_v6 = vld [vmem:[%s194_s1 + $0x48] sm:$0xff]  ;;  %s115_s21 = smov [#allocation3]   ;;  %s78_s25 = sshll.u32 %s196_s3, 4  ;;  %s79_s25 = int_to_ptr.hbm [resolvable:$true] %s78_s25 }
   0x8   :  { %41 = vmatpush.msra.mxu0 %v34_v3  ;;  %v30_v7 = vld [vmem:[%s194_s1 + $0x40] sm:$0xff]  ;;  %v29_v8 = vld [vmem:[%s194_s1 + $0x38] sm:$0xff]  ;;  %v28_v9 = vld [vmem:[%s194_s1 + $0x30] sm:$0xff]  ;;  %s76_s22 = sshll.u32 %s115_s21, 4  ;;  %s77_s22 = int_to_ptr.vmem [resolvable:$true] %s76_s22 }
   0x9   :  { %v27_v10 = vld [vmem:[%s194_s1 + $0x28] sm:$0xff]  ;;  %v26_v11 = vld [vmem:[%s194_s1 + $0x20] sm:$0xff]  ;;  %v25_v12 = vld [vmem:[%s194_s1 + $0x18] sm:$0xff] }
   0xa   :  { %42 = vmatpush.msra.mxu0 %v33_v4  ;;  %v24_v13 = vld [vmem:[%s194_s1 + $0x10] sm:$0xff]  ;;  %v23_v14 = vld [vmem:[%s194_s1 + $0x8] sm:$0xff]  ;;  %v22_v15 = vld [vmem:[%s194_s1] sm:$0xff] }
   0xb   :  { %v21_v16 = vld [vmem:[%s193_s0] sm:$0xff] }
   0xc   :  { %43 = vmatpush.msra.mxu0 %v32_v5  ;;  %v88_v17 = vld [vmem:[%s195_s2] ss:$0 sm:$0xff] }
   0xe   :  { %44 = vmatpush.msra.mxu0 %v31_v6 }
  0x10   :  { %45 = vmatpush.msra.mxu0 %v30_v7 }
  0x12   :  { %46 = vmatpush.msra.mxu0 %v29_v8 }
  0x14   :  { %47 = vmatpush.msra.mxu0 %v28_v9 }
  0x16   :  { %48 = vmatpush.msra.mxu0 %v27_v10 }
  0x18   :  { %49 = vmatpush.msra.mxu0 %v26_v11 }
  0x1a   :  { %50 = vmatpush.msra.mxu0 %v25_v12 }
  0x1c   :  { %51 = vmatpush.msra.mxu0 %v24_v13 }
  0x1e   :  { %52 = vmatpush.msra.mxu0 %v23_v14 }
  0x20   :  { %53 = vmatpush.msra.mxu0 %v22_v15 }
  0x21   :  { %54 = vmatmul.f32.vlgmr.msra.gmra.mxu0 %v21_v16 }
  0x9e   :  { %v55_v18 = vpop.f32.mrf.mxu0 }
  0x9f   :  { %v68_v19 = vadd.f32 %v88_v17, %v55_v18 }
  0xa1   :  { %v69_v20 = vmax.f32 %v68_v19, 0.0 }
  0xa3   :  { %70 = vst [vmem:[#allocation3] sm:$0xff] %v69_v20 }
  0xa4   :  { %81 = dma.vmem_to_hbm [thread:$0]  %s77_s22, 128, %s79_s25, [#allocation4]  }
  0xa5   :  { %113 = dma.done.wait [#allocation4], 128  }
  0xa6   :  { %114 = vsyncadd [#allocation4], 4294967168 }
  0xa7   :  { %86 = vsyncpa [#allocation4], 1 }

</bundles_post_ra>
